<compile_context>
chip_gen: v7x
topology: tpu7x:2x2x1
jax: 0.10.0
libtpu: 0.0.40
codegen_flags: <defaults>
</compile_context>

<pallas_src>
import functools

import jax
import jax.numpy as jnp
from jax import lax
from jax.experimental import pallas as pl
from jax.experimental.pallas import tpu as pltpu

_LANES = 128
_SUBLANES = 8
_IGNORE_INDEX = -100          # PyTorch CrossEntropyLoss default
_MAX_CLASS_CHUNK = 2048       # lanes per vocab chunk (multiple of 128)


def _cdiv(a, b):
    return (a + b - 1) // b


def _round_up(x, m):
    return ((x + m - 1) // m) * m


def _ce_kernel(logits_ref, labels_ref, w_ref, out_ref, m_sc, l_sc, g_sc, *,
               bs, c, mask_class_tail):
    # logits_ref: (tr, tc) input dtype (bf16/f32) — one vocab chunk of one row tile
    # labels_ref: (tr, 1)  int32, clamped to [0, C)
    # w_ref:      (tr, 1)  f32  (s_b**0.2 / (B*S); 0 for ignore_index / padded rows)
    # out_ref:    (1, 8, 128) f32 per-row-tile partial sum (written at last vocab chunk)
    # m_sc/l_sc/g_sc: (tr, 1) f32 online-logsumexp state (running max / sum-exp / x[label])
    i = pl.program_id(0)
    k = pl.program_id(1)
    nk = pl.num_programs(1)
    tr, tc = logits_ref.shape

    @pl.when(k == 0)
    def _():
        m_sc[...] = jnp.full(m_sc.shape, -jnp.inf, dtype=jnp.float32)
        l_sc[...] = jnp.zeros(l_sc.shape, dtype=jnp.float32)
        g_sc[...] = jnp.zeros(g_sc.shape, dtype=jnp.float32)

    x = logits_ref[...].astype(jnp.float32)                    # upcast one chunk only
    labels = labels_ref[...]                                   # (tr, 1)
    class_ids = k * tc + lax.broadcasted_iota(jnp.int32, (tr, tc), 1)
    if mask_class_tail:
        # Garbage lanes past C in the last chunk: kill them before max/exp (where, so any
        # NaN/Inf garbage is never selected).
        x = jnp.where(class_ids < c, x, -jnp.inf)

    # Online logsumexp update for this chunk.
    m_prev = m_sc[...]
    m_new = jnp.maximum(m_prev, jnp.max(x, axis=-1, keepdims=True))
    alpha = jnp.exp(m_prev - m_new)
    p = jnp.exp(x - m_new)
    l_sc[...] = alpha * l_sc[...] + jnp.sum(p, axis=-1, keepdims=True)
    m_sc[...] = m_new
    # Exact label gather (no max trick needed): labels are clamped to [0, C) so the garbage
    # class tail (ids >= C) can never match.
    g_sc[...] = g_sc[...] + jnp.sum(jnp.where(class_ids == labels, x, 0.0),
                                    axis=-1, keepdims=True)

    @pl.when(k == nk - 1)
    def _():
        # CE = logsumexp(x) - x[label] = m + log(l) - g
        ce = m_sc[...] + jnp.log(l_sc[...]) - g_sc[...]        # (tr, 1)
        # Row tail of the last row tile holds garbage (possibly NaN); mask BEFORE the
        # weighted sum so NaN * 0 can't poison the partial.
        row_ids = i * tr + lax.broadcasted_iota(jnp.int32, (tr, 1), 0)
        ce = jnp.where(row_ids < bs, ce, 0.0)
        partial = jnp.sum(ce * w_ref[...], axis=0, keepdims=True)   # (1, 1)
        out_ref[...] = jnp.broadcast_to(partial[None], (1, _SUBLANES, _LANES))


def custom_loss(logits, labels, s_values):
    """CrossEntropy path of CustomLoss.

    logits: (B, S, C) float (f32 or bf16); labels: (B, S) int; s_values: (B,) -> scalar f32.
    """
    B, S, C = logits.shape
    BS = B * S
    dtype = logits.dtype

    # --- class-dim chunking (keeps the row tile large for real vocabs) ---
    if C <= _MAX_CLASS_CHUNK:
        tc = C                      # single full-width chunk (block dim == full array dim)
        nk = 1
    else:
        tc = _MAX_CLASS_CHUNK       # multiple of 128 lanes
        nk = _cdiv(C, tc)
    mask_class_tail = (nk > 1) and (C % tc != 0)

    # --- generation-aware VMEM budget ---
    try:
        vmem_cap = int(pltpu.get_tpu_info().vmem_capacity_bytes)
    except Exception:  # be conservative if the query is unavailable
        vmem_cap = 64 * 1024 * 1024
    if vmem_cap >= 100 * 1024 * 1024:          # v5e / v6e: 128 MiB physical
        budget, vmem_limit = 24 * 1024 * 1024, 64 * 1024 * 1024
    else:                                      # v7x: 64 MiB per TensorCore
        budget, vmem_limit = 14 * 1024 * 1024, 40 * 1024 * 1024

    # --- row tile: 2x double-buffered input chunk + ~8 B/elem f32 chunk temporaries ---
    itemsize = jnp.dtype(dtype).itemsize
    bytes_per_row = tc * (2 * itemsize + 8) + 64
    tr = budget // bytes_per_row
    tr = min(tr, 2048)
    tr = min(tr, _round_up(_cdiv(BS, 2), _SUBLANES))   # >= 2 row tiles -> v7x megacore
    tr = max(_SUBLANES, (tr // _SUBLANES) * _SUBLANES)
    ni = _cdiv(BS, tr)
    BSp = ni * tr

    x = logits.reshape(BS, C)                          # no logits pad: tails masked in-kernel
    lbl = labels.reshape(BS).astype(jnp.int32)
    # Per-row weight folds s**0.2, the 1/S sequence mean, the 1/B batch mean and ignore_index.
    w_row = jnp.repeat(s_values.astype(jnp.float32) ** 0.2, S) / jnp.float32(B * S)
    w_row = jnp.where(lbl == _IGNORE_INDEX, 0.0, w_row)
    lbl = jnp.clip(lbl, 0, C - 1)
    if BSp != BS:                                      # tiny side-input pad only
        lbl = jnp.pad(lbl, (0, BSp - BS))
        w_row = jnp.pad(w_row, (0, BSp - BS))
    lbl = lbl.reshape(BSp, 1)
    w_row = w_row.reshape(BSp, 1)

    kernel = functools.partial(_ce_kernel, bs=BS, c=C, mask_class_tail=mask_class_tail)

    partials = pl.pallas_call(
        kernel,
        out_shape=jax.ShapeDtypeStruct((ni, _SUBLANES, _LANES), jnp.float32),
        grid=(ni, nk),                                 # reduction (vocab) axis last
        in_specs=[
            pl.BlockSpec((tr, tc), lambda i, k: (i, k)),   # logits vocab chunk
            pl.BlockSpec((tr, 1), lambda i, k: (i, 0)),    # labels (resident across k)
            pl.BlockSpec((tr, 1), lambda i, k: (i, 0)),    # per-row weights
        ],
        out_specs=pl.BlockSpec((1, _SUBLANES, _LANES), lambda i, k: (i, 0, 0)),
        scratch_shapes=[
            pltpu.VMEM((tr, 1), jnp.float32),   # running max
            pltpu.VMEM((tr, 1), jnp.float32),   # running sum-exp
            pltpu.VMEM((tr, 1), jnp.float32),   # x[label]
        ],
        compiler_params=pltpu.CompilerParams(
            dimension_semantics=("parallel", "arbitrary"),
            vmem_limit_bytes=vmem_limit,
        ),
    )(x, lbl, w_row)

    # TODO(synk): BCEWithLogitsLoss branch (model.num_labels == 1) not implemented; this
    # kernel covers the CrossEntropyLoss (num_labels > 1 / default) path of the module.
    # Tiny final reduction over per-row-tile partial sums (weights already include 1/(B*S)).
    return jnp.sum(partials[:, 0, 0])


def _reference_loss(logits, labels, s_values):
    # Pure-JAX reference matching the PyTorch CrossEntropyLoss(reduction='none') path.
    logits = logits.astype(jnp.float32)
    logp = jax.nn.log_softmax(logits, axis=-1)
    safe = jnp.clip(labels, 0, logits.shape[-1] - 1).astype(jnp.int32)
    ce = -jnp.take_along_axis(logp, safe[..., None], axis=-1)[..., 0]
    ce = jnp.where(labels == _IGNORE_INDEX, 0.0, ce)
    sample_loss = ce.mean(axis=1)
    weighted = sample_loss * (s_values.astype(jnp.float32) ** 0.2)
    return weighted.mean()


if __name__ == "__main__":
    key = jax.random.PRNGKey(0)

    def _check(B, S, C, with_ignore=False, seed_offset=0):
        k1, k2, k3 = jax.random.split(jax.random.fold_in(key, seed_offset), 3)
        logits = jax.random.normal(k1, (B, S, C), dtype=jnp.float32)
        labels = jax.random.randint(k2, (B, S), 0, C, dtype=jnp.int32)
        if with_ignore:
            labels = labels.at[0, 1].set(_IGNORE_INDEX)
        s_values = jax.random.uniform(k3, (B,), minval=0.5, maxval=2.0, dtype=jnp.float32)
        loss = jax.block_until_ready(jax.jit(custom_loss)(logits, labels, s_values))
        ref = _reference_loss(logits, labels, s_values)
        assert jnp.allclose(loss, ref, rtol=1e-5, atol=1e-5), (B, S, C, loss, ref)

    # Primary small case consistent with the module (batch=2, seq=8, num_labels=32).
    _check(2, 8, 32, seed_offset=0)
    # Row-tail (BS not a multiple of the row tile) + ignore_index path.
    _check(3, 7, 32, with_ignore=True, seed_offset=1)
    # Class-dim chunking path (C > 2048 with a non-multiple tail) exercising online logsumexp.
    _check(2, 4, 2500, seed_offset=2)

    print("KERNEL_OK")
</pallas_src>

<mosaic_0001>
module attributes {stable_mosaic.version = 11 : i64} {
  func.func @_ce_kernel(%arg0: i32, %arg1: i32, %arg2: memref<8x32xf32, #tpu.memory_space<vmem>>, %arg3: memref<8x1xi32, #tpu.memory_space<vmem>>, %arg4: memref<8x1xf32, #tpu.memory_space<vmem>>, %arg5: memref<1x8x128xf32, #tpu.memory_space<vmem>>, %arg6: memref<8x1xf32, #tpu.memory_space<vmem>>, %arg7: memref<8x1xf32, #tpu.memory_space<vmem>>, %arg8: memref<8x1xf32, #tpu.memory_space<vmem>>) attributes {dimension_semantics = [#tpu.dimension_semantics<parallel>, #tpu.dimension_semantics<arbitrary>], iteration_bounds = array<i64: 2, 1>, scalar_prefetch = 0 : i64, scratch_operands = 3 : i64, tpu.core_type = #tpu.core_type<tc>, window_params = [{transform_indices = @transform_0, window_bounds = array<i64: 8, 32>}, {transform_indices = @transform_1, window_bounds = array<i64: 8, 1>}, {transform_indices = @transform_2, window_bounds = array<i64: 8, 1>}, {transform_indices = @transform_3, window_bounds = array<i64: 1, 8, 128>}]} {
    %c0_i32 = arith.constant 0 : i32
    %0 = arith.cmpi eq, %arg1, %c0_i32 : i32
    %1 = arith.extui %0 : i1 to i32
    %c0_i32_0 = arith.constant 0 : i32
    %2 = arith.cmpi ne, %1, %c0_i32_0 : i32
    scf.if %2 {
      %cst_21 = arith.constant 0xFF800000 : f32
      %37 = vector.broadcast %cst_21 : f32 to vector<8x1xf32>
      %c0_22 = arith.constant 0 : index
      %c0_23 = arith.constant 0 : index
      %38 = vector.load %arg6[%c0_22, %c0_23] : memref<8x1xf32, #tpu.memory_space<vmem>>, vector<8x1xf32>
      tpu.vector_store %arg6[%c0_22, %c0_23], %37 {strides = array<i32>} : memref<8x1xf32, #tpu.memory_space<vmem>>, vector<8x1xf32>,
      %cst_24 = arith.constant 0.000000e+00 : f32
      %39 = vector.broadcast %cst_24 : f32 to vector<8x1xf32>
      %c0_25 = arith.constant 0 : index
      %c0_26 = arith.constant 0 : index
      %40 = vector.load %arg7[%c0_25, %c0_26] : memref<8x1xf32, #tpu.memory_space<vmem>>, vector<8x1xf32>
      tpu.vector_store %arg7[%c0_25, %c0_26], %39 {strides = array<i32>} : memref<8x1xf32, #tpu.memory_space<vmem>>, vector<8x1xf32>,
      %cst_27 = arith.constant 0.000000e+00 : f32
      %41 = vector.broadcast %cst_27 : f32 to vector<8x1xf32>
      %c0_28 = arith.constant 0 : index
      %c0_29 = arith.constant 0 : index
      %42 = vector.load %arg8[%c0_28, %c0_29] : memref<8x1xf32, #tpu.memory_space<vmem>>, vector<8x1xf32>
      tpu.vector_store %arg8[%c0_28, %c0_29], %41 {strides = array<i32>} : memref<8x1xf32, #tpu.memory_space<vmem>>, vector<8x1xf32>,
    } else {
    }
    %c0 = arith.constant 0 : index
    %c0_1 = arith.constant 0 : index
    %3 = vector.load %arg2[%c0, %c0_1] : memref<8x32xf32, #tpu.memory_space<vmem>>, vector<8x32xf32>
    %c0_2 = arith.constant 0 : index
    %c0_3 = arith.constant 0 : index
    %4 = vector.load %arg3[%c0_2, %c0_3] : memref<8x1xi32, #tpu.memory_space<vmem>>, vector<8x1xi32>
    %c32_i32 = arith.constant 32 : i32
    %5 = arith.muli %arg1, %c32_i32 : i32
    %6 = tpu.iota {dimensions = array<i32: 1>} : vector<8x32xi32>
    %7 = vector.broadcast %5 : i32 to vector<8x32xi32>
    %8 = arith.addi %7, %6 : vector<8x32xi32>
    %c0_4 = arith.constant 0 : index
    %c0_5 = arith.constant 0 : index
    %9 = vector.load %arg6[%c0_4, %c0_5] : memref<8x1xf32, #tpu.memory_space<vmem>>, vector<8x1xf32>
    %cst = arith.constant dense<0xFF800000> : vector<8xf32>
    %10 = vector.multi_reduction <maximumf>, %3, %cst [1] : vector<8x32xf32> to vector<8xf32>
    %11 = vector.shape_cast %10 : vector<8xf32> to vector<8x1xf32>
    %12 = arith.maximumf %9, %11 : vector<8x1xf32>
    %13 = arith.subf %9, %12 : vector<8x1xf32>
    %14 = math.exp %13 : vector<8x1xf32>
    %15 = vector.broadcast %12 : vector<8x1xf32> to vector<8x32xf32>
    %16 = arith.subf %3, %15 : vector<8x32xf32>
    %17 = math.exp %16 : vector<8x32xf32>
    %c0_6 = arith.constant 0 : index
    %c0_7 = arith.constant 0 : index
    %18 = vector.load %arg7[%c0_6, %c0_7] : memref<8x1xf32, #tpu.memory_space<vmem>>, vector<8x1xf32>
    %19 = arith.mulf %14, %18 : vector<8x1xf32>
    %cst_8 = arith.constant dense<0.000000e+00> : vector<8xf32>
    %20 = vector.multi_reduction <add>, %17, %cst_8 [1] : vector<8x32xf32> to vector<8xf32>
    %21 = vector.shape_cast %20 : vector<8xf32> to vector<8x1xf32>
    %22 = arith.addf %19, %21 : vector<8x1xf32>
    %c0_9 = arith.constant 0 : index
    %c0_10 = arith.constant 0 : index
    %23 = vector.load %arg7[%c0_9, %c0_10] : memref<8x1xf32, #tpu.memory_space<vmem>>, vector<8x1xf32>
    tpu.vector_store %arg7[%c0_9, %c0_10], %22 {strides = array<i32>} : memref<8x1xf32, #tpu.memory_space<vmem>>, vector<8x1xf32>,
    %c0_11 = arith.constant 0 : index
    %c0_12 = arith.constant 0 : index
    %24 = vector.load %arg6[%c0_11, %c0_12] : memref<8x1xf32, #tpu.memory_space<vmem>>, vector<8x1xf32>
    tpu.vector_store %arg6[%c0_11, %c0_12], %12 {strides = array<i32>} : memref<8x1xf32, #tpu.memory_space<vmem>>, vector<8x1xf32>,
    %c0_13 = arith.constant 0 : index
    %c0_14 = arith.constant 0 : index
    %25 = vector.load %arg8[%c0_13, %c0_14] : memref<8x1xf32, #tpu.memory_space<vmem>>, vector<8x1xf32>
    %26 = vector.broadcast %4 : vector<8x1xi32> to vector<8x32xi32>
    %27 = arith.cmpi eq, %8, %26 : vector<8x32xi32>
    %cst_15 = arith.constant 0.000000e+00 : f32
    %28 = vector.broadcast %cst_15 : f32 to vector<8x32xf32>
    %29 = arith.select %27, %3, %28 : vector<8x32xi1>, vector<8x32xf32>
    %cst_16 = arith.constant dense<0.000000e+00> : vector<8xf32>
    %30 = vector.multi_reduction <add>, %29, %cst_16 [1] : vector<8x32xf32> to vector<8xf32>
    %31 = vector.shape_cast %30 : vector<8xf32> to vector<8x1xf32>
    %32 = arith.addf %25, %31 : vector<8x1xf32>
    %c0_17 = arith.constant 0 : index
    %c0_18 = arith.constant 0 : index
    %33 = vector.load %arg8[%c0_17, %c0_18] : memref<8x1xf32, #tpu.memory_space<vmem>>, vector<8x1xf32>
    tpu.vector_store %arg8[%c0_17, %c0_18], %32 {strides = array<i32>} : memref<8x1xf32, #tpu.memory_space<vmem>>, vector<8x1xf32>,
    %c0_i32_19 = arith.constant 0 : i32
    %34 = arith.cmpi eq, %arg1, %c0_i32_19 : i32
    %35 = arith.extui %34 : i1 to i32
    %c0_i32_20 = arith.constant 0 : i32
    %36 = arith.cmpi ne, %35, %c0_i32_20 : i32
    scf.if %36 {
      %c0_21 = arith.constant 0 : index
      %c0_22 = arith.constant 0 : index
      %37 = vector.load %arg6[%c0_21, %c0_22] : memref<8x1xf32, #tpu.memory_space<vmem>>, vector<8x1xf32>
      %c0_23 = arith.constant 0 : index
      %c0_24 = arith.constant 0 : index
      %38 = vector.load %arg7[%c0_23, %c0_24] : memref<8x1xf32, #tpu.memory_space<vmem>>, vector<8x1xf32>
      %39 = math.log %38 : vector<8x1xf32>
      %40 = arith.addf %37, %39 : vector<8x1xf32>
      %c0_25 = arith.constant 0 : index
      %c0_26 = arith.constant 0 : index
      %41 = vector.load %arg8[%c0_25, %c0_26] : memref<8x1xf32, #tpu.memory_space<vmem>>, vector<8x1xf32>
      %42 = arith.subf %40, %41 : vector<8x1xf32>
      %c8_i32 = arith.constant 8 : i32
      %43 = arith.muli %arg0, %c8_i32 : i32
      %44 = tpu.iota {dimensions = array<i32: 0>} : vector<8x1xi32>
      %45 = vector.broadcast %43 : i32 to vector<8x1xi32>
      %46 = arith.addi %45, %44 : vector<8x1xi32>
      %c16_i32 = arith.constant 16 : i32
      %47 = vector.broadcast %c16_i32 : i32 to vector<8x1xi32>
      %48 = arith.cmpi slt, %46, %47 : vector<8x1xi32>
      %cst_27 = arith.constant 0.000000e+00 : f32
      %49 = vector.broadcast %cst_27 : f32 to vector<8x1xf32>
      %50 = arith.select %48, %42, %49 : vector<8x1xi1>, vector<8x1xf32>
      %c0_28 = arith.constant 0 : index
      %c0_29 = arith.constant 0 : index
      %51 = vector.load %arg4[%c0_28, %c0_29] : memref<8x1xf32, #tpu.memory_space<vmem>>, vector<8x1xf32>
      %52 = arith.mulf %50, %51 : vector<8x1xf32>
      %cst_30 = arith.constant dense<0.000000e+00> : vector<1xf32>
      %53 = vector.multi_reduction <add>, %52, %cst_30 [0] : vector<8x1xf32> to vector<1xf32>
      %54 = vector.shape_cast %53 : vector<1xf32> to vector<1x1xf32>
      %55 = vector.shape_cast %54 : vector<1x1xf32> to vector<1x1x1xf32>
      %56 = vector.shape_cast %55 : vector<1x1x1xf32> to vector<1x1x1xf32>
      %57 = vector.broadcast %56 : vector<1x1x1xf32> to vector<1x8x128xf32>
      %c0_31 = arith.constant 0 : index
      %c0_32 = arith.constant 0 : index
      %c0_33 = arith.constant 0 : index
      %58 = vector.load %arg5[%c0_31, %c0_32, %c0_33] : memref<1x8x128xf32, #tpu.memory_space<vmem>>, vector<1x8x128xf32>
      tpu.vector_store %arg5[%c0_31, %c0_32, %c0_33], %57 {strides = array<i32>} : memref<1x8x128xf32, #tpu.memory_space<vmem>>, vector<1x8x128xf32>,
    } else {
    }
    return
  }
  func.func @transform_0(%arg0: i32, %arg1: i32) -> (i32, i32) {
    %c0_i32 = arith.constant 0 : i32
    return %arg0, %arg1 : i32, i32
  }
  func.func @transform_1(%arg0: i32, %arg1: i32) -> (i32, i32) {
    %c0_i32 = arith.constant 0 : i32
    %c0_i32_0 = arith.constant 0 : i32
    return %arg0, %c0_i32 : i32, i32
  }
  func.func @transform_2(%arg0: i32, %arg1: i32) -> (i32, i32) {
    %c0_i32 = arith.constant 0 : i32
    %c0_i32_0 = arith.constant 0 : i32
    return %arg0, %c0_i32 : i32, i32
  }
  func.func @transform_3(%arg0: i32, %arg1: i32) -> (i32, i32, i32) {
    %c0_i32 = arith.constant 0 : i32
    %c0_i32_0 = arith.constant 0 : i32
    %c0_i32_1 = arith.constant 0 : i32
    return %arg0, %c0_i32, %c0_i32_0 : i32, i32, i32
  }
}

</mosaic_0001>

<bundles_post_ra>
// kernel: custom_loss.1
= control target key start
LH: loop header
LB: loop body
LE: loop exit
PB: predicated region body
PF: predicated region fallthrough
CT: control target
= control target key end

     0   :  { %s489_s12 = smov 0   ;;  %s491_s13 = smov 0   ;;  %s549_s0 = inlined_call_operand.vmem [shape: f32[16,32], index: 0, kind: input, shape index: {}]   ;;  %s550_s1 = inlined_call_operand.vmem [shape: s32[16,1], index: 1, kind: input, shape index: {}]   ;;  %s551_s2 = inlined_call_operand.vmem [shape: f32[16,1], index: 2, kind: input, shape index: {}]   ;;  %s552_s3 = inlined_call_operand.vmem [shape: f32[2,8,128], index: 3, kind: output, shape index: {}]  }
   0x1   :  { %s493_s14 = smov 0  }
   0x2 LB: > { %s25_s15 = sadd.s32 1, %s460_s13  ;;  %p399_p0 = scmp.ge.s32.totalorder %s464_s14, 1  ;;  %s464_s14 = sphi %s493_s14, %s13_s14   ;;  %s460_s13 = sphi %s491_s13, %s554_s13   ;;  %s456_s12 = sphi %s489_s12, %s553_s12  }
   0x3   : > { %p27_p1 = scmp.ge.s32.totalorder %s25_s15, 2  ;;  %p171_p2 = scmp.lt.s32.totalorder %s464_s14, 3 }
   0x5   : > { %s556_s15 = smov (%p27_p1, %s25_s15), 0  ;;  %p172_p3 = pnand %p399_p0, %p171_p2 }
   0x6   : > { %p204_p4 = scmp.lt.s32.totalorder (!%p172_p3), %s456_s12, 1  ;;  %vm227_vm0 = vcmask (!%p172_p3), 7168   ;;  %v466_v0 = vmov (!%p172_p3), -inf   ;;  %vm239_vm1 = vcmask (!%p172_p3), 261120   ;;  %v467_v3 = vmov (!%p172_p3), 0   ;;  %s404_s24 = sshll.u32 (!%p172_p3), %s456_s12, 3 }
   0x7   : > { %175 = sbr.rel (%p172_p3) target bundleno = 622 (0x26e), region = 32  ;;  %228 = vst.msk [vmem:[#allocation2] sm:$0xff] (!%p172_p3), %vm227_vm0, %v466_v0  ;;  %434 = vset.pattern.permute.xlu0 (!%p172_p3), %v467_v3  ;;  %435 = vset.pattern.permute.xlu1 (!%p172_p3), %v467_v3  ;;  %v468_v5 = vmov (!%p172_p3), 0.0   ;;  %v234_v13 = vlaneseq (!%p172_p3)  ;;  %v288_v31 = vstv (!%p172_p3), %s404_s24 }
   0x8   : > { %229 = vst.msk [vmem:[#allocation3] sm:$0xff] (!%p172_p3), %vm227_vm0, %v468_v5  ;;  %230 = vst.msk [vmem:[#allocation4] sm:$0xff] (!%p172_p3), %vm227_vm0, %v468_v5 }
   0x9   : > { %v235_v14 = vand.u32 (!%p172_p3), 127, %v234_v13  ;;  %v287_v30 = vshrl.u32 (!%p172_p3), %v234_v13, 7 }
   0xb   : > { %v289_v33 = vadd.s32 (!%p172_p3), %v288_v31, %v287_v30 }
   0xd   : > { %vm290_vm3 = vcmp.lt.s32.totalorder (!%p172_p3), %v289_v33, 16 }
   0xe   : > { %s205_s16 = scalar_select %p204_p4, %s456_s12, 1  ;;  %v238_v6 = vld [vmem:[#allocation2] sm:$0xff] }
   0xf   : > { %v255_v22 = vld [vmem:[#allocation3] sm:$0xff]  ;;  %v264_v26 = vld [vmem:[#allocation4] sm:$0xff] }
  0x10   : > { %s512_s17 = sshll.u32 %s205_s16, 3 }
  0x11   : > { %s210_s20 = scalar_lea.vmem %s549_s0, %s512_s17  ;;  %s214_s23 = scalar_lea.vmem %s550_s1, %s512_s17 }
  0x12   : > { %v231_v1 = vld [vmem:[%s210_s20] sm:$0xff]  ;;  %s218_s27 = scalar_lea.vmem %s551_s2, %s512_s17  ;;  %s222_s30 = scalar_lea.vmem %s552_s3, %s512_s17 }
  0x13   : > { %v240_v2 = vsel %vm239_vm1, %v231_v1, -inf  ;;  %v232_v4 = vld [vmem:[%s214_s23] sm:$0xff] }
  0x14   : > { %241 = vmax.xlane.f32.xlu0 %v240_v2  ;;  %266 = vperm.xlu1 %435, %v232_v4   ;;  %v292_v38 = vld [vmem:[%s218_s27] sm:$0xff] }
  0x93   : > { %v267_v15 = vpop.permute.xlu1 %266 }
  0x94   : > { %vm268_vm2 = vcmp.eq.s32.totalorder %v235_v14, %v267_v15 }
  0x95   : > { %v269_v17 = vsel %vm268_vm2, %v231_v1, 0.0 }
  0x96   : > { %v270_v19 = vsel %vm239_vm1, %v269_v17, 0.0 }
  0xa1   : > { %v242_v7 = vpop.xlane.xlu0 %241 }
  0xa2   : > { %v243_v8 = vmax.f32 %v238_v6, %v242_v7 }
  0xa4   : > { %v244_v9 = vsub.f32 %v238_v6, %v243_v8  ;;  %263 = vst.msk [vmem:[#allocation2] sm:$0xff] %vm227_vm0, %v243_v8  ;;  %249 = vperm.xlu0 %434, %v243_v8  }
  0xa6   : > { %v245_v20 = vmul.f32 1.442695, %v244_v9 }
  0xab   : > { %v278_v35 = vld [vmem:[#allocation2] sm:$0xff] }
 0x123   : > { %v250_v10 = vpop.permute.xlu0 %249 }
 0x124   : > { %v252_v11 = vsub.f32 %v231_v1, %v250_v10 }
 0x126   : > { %v253_v12 = vmul.f32 1.442695, %v252_v11 }
 0x128   : > { %436 = vpow2.f32 %v253_v12 }
 0x129   : > { %438 = vpow2.f32 %v245_v20 }
 0x132   : > { %v437_v16 = vpop.eup %436 }
 0x133   : > { %v257_v18 = vsel %vm239_vm1, %v437_v16, 0.0  ;;  %v439_v21 = vpop.eup %438 }
 0x134   : > { %258 = vadd.xlane.f32.xlu1 %v257_v18  ;;  %v256_v23 = vmul.f32 %v439_v21, %v255_v22 }
 0x138   : > { %271 = vadd.xlane.f32.xlu1 %v270_v19 }
 0x1c1   : > { %v259_v24 = vpop.xlane.xlu1 %258 }
 0x1c2   : > { %v260_v25 = vadd.f32 %v259_v24, %v256_v23 }
 0x1c4   : > { %262 = vst.msk [vmem:[#allocation3] sm:$0xff] %vm227_vm0, %v260_v25 }
 0x1c5   : > { %v272_v27 = vpop.xlane.xlu1 %271 }
 0x1c6   : > { %v273_v28 = vadd.f32 %v272_v27, %v264_v26 }
 0x1c8   : > { %274 = vst.msk [vmem:[#allocation4] sm:$0xff] %vm227_vm0, %v273_v28 }
 0x1cb   : > { %v279_v29 = vld [vmem:[#allocation3] sm:$0xff] }
 0x1cc   : > { %440 = vlog2.f32 %v279_v29 }
 0x1cf   : > { %v283_v36 = vld [vmem:[#allocation4] sm:$0xff] }
 0x1d6   : > { %v441_v32 = vpop.eup %440 }
 0x1d7   : > { %v281_v34 = vmul.f32 0.6931472, %v441_v32 }
 0x1d9   : > { %v282_v37 = vadd.f32 %v281_v34, %v278_v35 }
 0x1db   : > { %v284_v39 = vsub.f32 %v282_v37, %v283_v36 }
 0x1dd   : > { %v291_v40 = vsel %vm290_vm3, %v284_v39, 0.0 }
 0x1de   : > { %v293_v41 = vmul.f32 %v292_v38, %v291_v40 }
 0x1e0   : > { %v294_v42 = vsel %vm227_vm0, %v293_v41, 0.0 }
 0x1e1   : > { %v295_v43 = vrot.slane %v294_v42, 4 }
 0x1e3   : > { %v296_v44 = vadd.f32 %v295_v43, %v294_v42 }
 0x1e5   : > { %v297_v45 = vrot.slane %v296_v44, 2 }
 0x1e7   : > { %v298_v46 = vadd.f32 %v297_v45, %v296_v44 }
 0x1e9   : > { %v299_v47 = vrot.slane %v298_v46, 1 }
 0x1eb   : > { %v300_v48 = vadd.f32 %v299_v47, %v298_v46 }
 0x1ed   : > { %303 = vperm.xlu1 %435, %v300_v48  }
 0x26c   : > { %v304_v49 = vpop.permute.xlu1 %303 }
 0x26d   : > { %306 = vst [vmem:[%s222_s30] sm:$0xff] %v304_v49 }
 0x26e PF: > { %s13_s14 = sadd.s32 1, %s464_s14   ;;  %s553_s12 = smov %s460_s13 }
 0x26f   : > { %p10_p5 = scmp.ge.s32.totalorder %s13_s14, 4   ;;  %s554_s13 = smov %s556_s15 }
 0x271   :  { %12 = sbr.rel (!%p10_p5) target bundleno = 2 (0x2), region = 76 }

</bundles_post_ra>
